<compile_context>
chip_gen: v7x
topology: tpu7x:2x2x1
jax: 0.10.0
libtpu: 0.0.40
codegen_flags: <defaults>
</compile_context>

<pallas_src>
import jax
import jax.numpy as jnp
from jax.experimental import pallas as pl
from jax.experimental.pallas import tpu as pltpu

HIDDEN = 32          # logical hidden width of the PyTorch module
HIDDEN_PAD = 128     # lane-dense padded hidden width
LANE = 128           # lane-dense padded output width
MAX_BATCH_TILE = 8192


def _round_up(x, m):
    return (x + m - 1) // m * m


def _mlp_kernel(x_ref, w1_ref, b1_ref, w2_ref, b2_ref, w3_ref, b3_ref, o_ref):
    # f32 x tile straight from HBM; VPU cast to bf16 is hidden under the DMA.
    x = x_ref[...].astype(jnp.bfloat16)
    # layer_in + ReLU (bf16 operands, f32 MXU accumulation; bias/ReLU in f32)
    h1 = jnp.dot(x, w1_ref[...], preferred_element_type=jnp.float32)
    h1 = jnp.maximum(h1 + b1_ref[...], 0.0).astype(jnp.bfloat16)
    # layer_1 + ReLU
    h2 = jnp.dot(h1, w2_ref[...], preferred_element_type=jnp.float32)
    h2 = jnp.maximum(h2 + b2_ref[...], 0.0).astype(jnp.bfloat16)
    # layer_out (no activation); lane-dense (padded-to-128) bf16 output store —
    # halves the dominant HBM write stream.
    out = jnp.dot(h2, w3_ref[...], preferred_element_type=jnp.float32)
    o_ref[...] = (out + b3_ref[...]).astype(o_ref.dtype)


def _pad_params(params):
    """Zero-pad hidden/output dims to lane-dense widths; cast weights to bf16.

    Padded hidden biases are 0 so ReLU(0)=0, and padded weight rows/cols are 0,
    so the padded network computes exactly the same values in the real columns.
    """
    input_size = params["w1"].shape[0]
    output_size = params["w3"].shape[1]

    def pad2(a, shape):
        return jnp.zeros(shape, a.dtype).at[: a.shape[0], : a.shape[1]].set(a)

    w1 = pad2(params["w1"], (input_size, HIDDEN_PAD)).astype(jnp.bfloat16)
    b1 = pad2(params["b1"], (1, HIDDEN_PAD))                       # f32
    w2 = pad2(params["w2"], (HIDDEN_PAD, HIDDEN_PAD)).astype(jnp.bfloat16)
    b2 = pad2(params["b2"], (1, HIDDEN_PAD))                       # f32
    w3 = pad2(params["w3"], (HIDDEN_PAD, LANE)).astype(jnp.bfloat16)
    b3 = pad2(params["b3"], (1, LANE))                             # f32
    return w1, b1, w2, b2, w3, b3, output_size


def penalty_network_forward(x, params, *, batch_tile=4096, min_kernel_batch=1024,
                            force_kernel=False):
    """x: [B, input_size] float32. params: dict of transposed weights / biases."""
    B, input_size = x.shape

    # Tiny batches: the pallas_call launch + pipeline prologue dwarfs the compute;
    # let XLA fuse the three matmuls instead.
    if B < min_kernel_batch and not force_kernel:
        return reference_forward(x, params)

    w1, b1, w2, b2, w3, b3, output_size = _pad_params(params)

    # Effective batch tile:
    #   * multiple of 16 (bf16 sublane packing),
    #   * <= ceil(B/2) (rounded) so the "parallel" grid has >= 2 steps whenever
    #     B >= 32 — keeps both v7x TensorCores busy,
    #   * <= the 16-rounded batch, and <= MAX_BATCH_TILE (keeps double-buffered
    #     tiles a few MiB; no explicit vmem_limit_bytes needed on any generation
    #     now that the output is bf16).
    half_B = _round_up(max(-(-B // 2), 16), 16)
    bt = min(_round_up(batch_tile, 16), half_B, _round_up(B, 16), MAX_BATCH_TILE)

    grid = (pl.cdiv(B, bt),)
    const = lambda i: (0, 0)  # weights/biases are grid-invariant

    out_padded = pl.pallas_call(
        _mlp_kernel,
        # No wrapper-side row padding: Pallas masks the final partial tile.
        # Safe because every output row depends only on its own input row.
        out_shape=jax.ShapeDtypeStruct((B, LANE), jnp.bfloat16),
        grid_spec=pltpu.PrefetchScalarGridSpec(
            num_scalar_prefetch=0,
            grid=grid,
            in_specs=[
                pl.BlockSpec((bt, input_size), lambda i: (i, 0)),      # x tile (f32)
                pl.BlockSpec((input_size, HIDDEN_PAD), const),         # W_in^T  (padded, bf16)
                pl.BlockSpec((1, HIDDEN_PAD), const),                  # b_in    (padded, f32)
                pl.BlockSpec((HIDDEN_PAD, HIDDEN_PAD), const),         # W_1^T   (padded, bf16)
                pl.BlockSpec((1, HIDDEN_PAD), const),                  # b_1     (padded, f32)
                pl.BlockSpec((HIDDEN_PAD, LANE), const),               # W_out^T (padded, bf16)
                pl.BlockSpec((1, LANE), const),                        # b_out   (padded, f32)
            ],
            out_specs=pl.BlockSpec((bt, LANE), lambda i: (i, 0)),      # lane-dense bf16 out
        ),
        compiler_params=pltpu.CompilerParams(
            dimension_semantics=("parallel",),
        ),
    )(x, w1, b1, w2, b2, w3, b3)

    # Slice the real output columns; cast back to f32 for PyTorch-f32 callers.
    # (Callers that can consume the padded bf16 [B,128] slab may skip this.)
    return out_padded[:, :output_size].astype(jnp.float32)


def init_params(key, input_size, output_size):
    """Deterministic init matching the nn.Linear shapes; weights stored transposed."""
    k1, k2, k3, k4, k5, k6 = jax.random.split(key, 6)

    def linear(kw, kb, fan_in, fan_out):
        bound = 1.0 / jnp.sqrt(fan_in)
        w = jax.random.uniform(kw, (fan_out, fan_in), jnp.float32, -bound, bound)
        b = jax.random.uniform(kb, (fan_out,), jnp.float32, -bound, bound)
        return w.T, b.reshape(1, fan_out)  # transpose for x @ W, keep bias 2D

    w1, b1 = linear(k1, k2, input_size, HIDDEN)
    w2, b2 = linear(k3, k4, HIDDEN, HIDDEN)
    w3, b3 = linear(k5, k6, HIDDEN, output_size)
    return {"w1": w1, "b1": b1, "w2": w2, "b2": b2, "w3": w3, "b3": b3}


def reference_forward(x, params):
    """Pure-f32 reference (exact PyTorch forward semantics)."""
    h1 = jnp.maximum(x @ params["w1"] + params["b1"], 0.0)
    h2 = jnp.maximum(h1 @ params["w2"] + params["b2"], 0.0)
    return h2 @ params["w3"] + params["b3"]


def reference_forward_bf16(x, params):
    """Reference mimicking the kernel's bf16 operands / f32 accumulation / bf16 store."""
    bf = jnp.bfloat16
    h1 = jnp.dot(x.astype(bf), params["w1"].astype(bf),
                 preferred_element_type=jnp.float32)
    h1 = jnp.maximum(h1 + params["b1"], 0.0).astype(bf)
    h2 = jnp.dot(h1, params["w2"].astype(bf),
                 preferred_element_type=jnp.float32)
    h2 = jnp.maximum(h2 + params["b2"], 0.0).astype(bf)
    out = jnp.dot(h2, params["w3"].astype(bf),
                  preferred_element_type=jnp.float32)
    return (out + params["b3"]).astype(bf).astype(jnp.float32)


if __name__ == "__main__":
    input_size = 16
    output_size = 4
    batch = 64

    key = jax.random.PRNGKey(0)
    kx, kp = jax.random.split(key)
    x = jax.random.normal(kx, (batch, input_size), jnp.float32)
    params = init_params(kp, input_size, output_size)

    # Force the Pallas path at this small test size (production dispatch falls back
    # to the fused-XLA MLP below ~1K rows). batch_tile=16 -> 4-step "parallel" grid.
    out = penalty_network_forward(x, params, batch_tile=16, force_kernel=True)
    out = jax.block_until_ready(out)
    assert out.shape == (batch, output_size)

    # Tight check vs a reference using the same bf16 operands / f32 accum / bf16 store.
    ref_bf16 = reference_forward_bf16(x, params)
    assert jnp.allclose(out, ref_bf16, atol=1e-2, rtol=1e-2), "mismatch vs bf16 reference"

    # Loose sanity check vs the pure-f32 module semantics (bf16 precision only).
    ref_f32 = reference_forward(x, params)
    assert jnp.allclose(out, ref_f32, atol=5e-2, rtol=5e-2), "mismatch vs f32 reference"

    print("KERNEL_OK")
</pallas_src>

<mosaic_0001>
module attributes {stable_mosaic.version = 11 : i64} {
  func.func @_mlp_kernel(%arg0: i32, %arg1: memref<16x16xf32, #tpu.memory_space<vmem>>, %arg2: memref<16x128xbf16, #tpu.memory_space<vmem>>, %arg3: memref<1x128xf32, #tpu.memory_space<vmem>>, %arg4: memref<128x128xbf16, #tpu.memory_space<vmem>>, %arg5: memref<1x128xf32, #tpu.memory_space<vmem>>, %arg6: memref<128x128xbf16, #tpu.memory_space<vmem>>, %arg7: memref<1x128xf32, #tpu.memory_space<vmem>>, %arg8: memref<16x128xbf16, #tpu.memory_space<vmem>>) attributes {dimension_semantics = [#tpu.dimension_semantics<parallel>], iteration_bounds = array<i64: 4>, scalar_prefetch = 0 : i64, scratch_operands = 0 : i64, tpu.core_type = #tpu.core_type<tc>, window_params = [{transform_indices = @transform_0, window_bounds = array<i64: 16, 16>}, {pipeline_mode = #tpu.pipeline_mode<synchronous>, transform_indices = @transform_1, window_bounds = array<i64: 16, 128>}, {pipeline_mode = #tpu.pipeline_mode<synchronous>, transform_indices = @transform_2, window_bounds = array<i64: 1, 128>}, {pipeline_mode = #tpu.pipeline_mode<synchronous>, transform_indices = @transform_3, window_bounds = array<i64: 128, 128>}, {pipeline_mode = #tpu.pipeline_mode<synchronous>, transform_indices = @transform_4, window_bounds = array<i64: 1, 128>}, {pipeline_mode = #tpu.pipeline_mode<synchronous>, transform_indices = @transform_5, window_bounds = array<i64: 128, 128>}, {pipeline_mode = #tpu.pipeline_mode<synchronous>, transform_indices = @transform_6, window_bounds = array<i64: 1, 128>}, {transform_indices = @transform_7, window_bounds = array<i64: 16, 128>}]} {
    %c0 = arith.constant 0 : index
    %c0_0 = arith.constant 0 : index
    %0 = vector.load %arg1[%c0, %c0_0] : memref<16x16xf32, #tpu.memory_space<vmem>>, vector<16x16xf32>
    %1 = arith.truncf %0 : vector<16x16xf32> to vector<16x16xbf16>
    %c0_1 = arith.constant 0 : index
    %c0_2 = arith.constant 0 : index
    %2 = vector.load %arg2[%c0_1, %c0_2] : memref<16x128xbf16, #tpu.memory_space<vmem>>, vector<16x128xbf16>
    %cst = arith.constant dense<0.000000e+00> : vector<16x128xf32>
    %3 = tpu.matmul %1, %2, %cst {dimension_numbers = #tpu.dot_dimension_numbers<[1], [0], [0], [1], [0, 0, 1, 1], [], []>} : vector<16x16xbf16>, vector<16x128xbf16>, vector<16x128xf32> -> vector<16x128xf32>
    %c0_3 = arith.constant 0 : index
    %c0_4 = arith.constant 0 : index
    %4 = vector.load %arg3[%c0_3, %c0_4] : memref<1x128xf32, #tpu.memory_space<vmem>>, vector<1x128xf32>
    %5 = vector.broadcast %4 : vector<1x128xf32> to vector<16x128xf32>
    %6 = arith.addf %3, %5 : vector<16x128xf32>
    %cst_5 = arith.constant 0.000000e+00 : f32
    %7 = vector.broadcast %cst_5 : f32 to vector<16x128xf32>
    %8 = arith.maximumf %6, %7 : vector<16x128xf32>
    %9 = arith.truncf %8 : vector<16x128xf32> to vector<16x128xbf16>
    %c0_6 = arith.constant 0 : index
    %c0_7 = arith.constant 0 : index
    %10 = vector.load %arg4[%c0_6, %c0_7] : memref<128x128xbf16, #tpu.memory_space<vmem>>, vector<128x128xbf16>
    %cst_8 = arith.constant dense<0.000000e+00> : vector<16x128xf32>
    %11 = tpu.matmul %9, %10, %cst_8 {dimension_numbers = #tpu.dot_dimension_numbers<[1], [0], [0], [1], [0, 0, 1, 1], [], []>} : vector<16x128xbf16>, vector<128x128xbf16>, vector<16x128xf32> -> vector<16x128xf32>
    %c0_9 = arith.constant 0 : index
    %c0_10 = arith.constant 0 : index
    %12 = vector.load %arg5[%c0_9, %c0_10] : memref<1x128xf32, #tpu.memory_space<vmem>>, vector<1x128xf32>
    %13 = vector.broadcast %12 : vector<1x128xf32> to vector<16x128xf32>
    %14 = arith.addf %11, %13 : vector<16x128xf32>
    %cst_11 = arith.constant 0.000000e+00 : f32
    %15 = vector.broadcast %cst_11 : f32 to vector<16x128xf32>
    %16 = arith.maximumf %14, %15 : vector<16x128xf32>
    %17 = arith.truncf %16 : vector<16x128xf32> to vector<16x128xbf16>
    %c0_12 = arith.constant 0 : index
    %c0_13 = arith.constant 0 : index
    %18 = vector.load %arg6[%c0_12, %c0_13] : memref<128x128xbf16, #tpu.memory_space<vmem>>, vector<128x128xbf16>
    %cst_14 = arith.constant dense<0.000000e+00> : vector<16x128xf32>
    %19 = tpu.matmul %17, %18, %cst_14 {dimension_numbers = #tpu.dot_dimension_numbers<[1], [0], [0], [1], [0, 0, 1, 1], [], []>} : vector<16x128xbf16>, vector<128x128xbf16>, vector<16x128xf32> -> vector<16x128xf32>
    %c0_15 = arith.constant 0 : index
    %c0_16 = arith.constant 0 : index
    %20 = vector.load %arg7[%c0_15, %c0_16] : memref<1x128xf32, #tpu.memory_space<vmem>>, vector<1x128xf32>
    %21 = vector.broadcast %20 : vector<1x128xf32> to vector<16x128xf32>
    %22 = arith.addf %19, %21 : vector<16x128xf32>
    %23 = arith.truncf %22 : vector<16x128xf32> to vector<16x128xbf16>
    %c0_17 = arith.constant 0 : index
    %c0_18 = arith.constant 0 : index
    %24 = vector.load %arg8[%c0_17, %c0_18] : memref<16x128xbf16, #tpu.memory_space<vmem>>, vector<16x128xbf16>
    tpu.vector_store %arg8[%c0_17, %c0_18], %23 {strides = array<i32>} : memref<16x128xbf16, #tpu.memory_space<vmem>>, vector<16x128xbf16>,
    return
  }
  func.func @transform_0(%arg0: i32) -> (i32, i32) {
    %c0_i32 = arith.constant 0 : i32
    %c0_i32_0 = arith.constant 0 : i32
    return %arg0, %c0_i32 : i32, i32
  }
  func.func @transform_1(%arg0: i32) -> (i32, i32) {
    %c0_i32 = arith.constant 0 : i32
    %c0_i32_0 = arith.constant 0 : i32
    %c0_i32_1 = arith.constant 0 : i32
    return %c0_i32, %c0_i32_0 : i32, i32
  }
  func.func @transform_2(%arg0: i32) -> (i32, i32) {
    %c0_i32 = arith.constant 0 : i32
    %c0_i32_0 = arith.constant 0 : i32
    %c0_i32_1 = arith.constant 0 : i32
    return %c0_i32, %c0_i32_0 : i32, i32
  }
  func.func @transform_3(%arg0: i32) -> (i32, i32) {
    %c0_i32 = arith.constant 0 : i32
    %c0_i32_0 = arith.constant 0 : i32
    %c0_i32_1 = arith.constant 0 : i32
    return %c0_i32, %c0_i32_0 : i32, i32
  }
  func.func @transform_4(%arg0: i32) -> (i32, i32) {
    %c0_i32 = arith.constant 0 : i32
    %c0_i32_0 = arith.constant 0 : i32
    %c0_i32_1 = arith.constant 0 : i32
    return %c0_i32, %c0_i32_0 : i32, i32
  }
  func.func @transform_5(%arg0: i32) -> (i32, i32) {
    %c0_i32 = arith.constant 0 : i32
    %c0_i32_0 = arith.constant 0 : i32
    %c0_i32_1 = arith.constant 0 : i32
    return %c0_i32, %c0_i32_0 : i32, i32
  }
  func.func @transform_6(%arg0: i32) -> (i32, i32) {
    %c0_i32 = arith.constant 0 : i32
    %c0_i32_0 = arith.constant 0 : i32
    %c0_i32_1 = arith.constant 0 : i32
    return %c0_i32, %c0_i32_0 : i32, i32
  }
  func.func @transform_7(%arg0: i32) -> (i32, i32) {
    %c0_i32 = arith.constant 0 : i32
    %c0_i32_0 = arith.constant 0 : i32
    return %arg0, %c0_i32 : i32, i32
  }
}

</mosaic_0001>

<bundles_post_ra>
// kernel: tpu_custom_call.1
= control target key start
LH: loop header
LB: loop body
LE: loop exit
PB: predicated region body
PF: predicated region fallthrough
CT: control target
= control target key end

     0   :  { %12 = vsyncpa [#allocation3], 0  ;;  %s1211_s0 = inlined_call_operand.vmem [shape: f32[64,16], index: 0, kind: input, shape index: {}]   ;;  %s1212_s1 = inlined_call_operand.vmem [shape: bf16[16,128], index: 1, kind: input, shape index: {}]   ;;  %s1213_s2 = inlined_call_operand.vmem [shape: f32[1,128], index: 2, kind: input, shape index: {}]   ;;  %s1214_s3 = inlined_call_operand.vmem [shape: bf16[128,128], index: 3, kind: input, shape index: {}]   ;;  %s1215_s4 = inlined_call_operand.vmem [shape: f32[1,128], index: 4, kind: input, shape index: {}]   ;;  %s1216_s5 = inlined_call_operand.hbm [shape: bf16[128,128], index: 5, kind: input, shape index: {}]   ;;  %s1217_s6 = inlined_call_operand.vmem [shape: f32[1,128], index: 6, kind: input, shape index: {}]   ;;  %s1218_s7 = inlined_call_operand.hbm [shape: bf16[64,128], index: 7, kind: output, shape index: {}]  }
   0x1   :  { %13 = vsyncpa [#allocation4], 0 }
   0x2   :  { %15 = vsyncpa [#allocation4 + $0x1], 0  ;;  %s1015_s24 = smov 0   ;;  %s1017_s25 = smov 0  }
   0x3   :  { %s1019_s26 = smov 0   ;;  %s1021_s27 = smov 0  }
   0x4 LB: > { %s1036_s28 = sadd.s32 4294967295, %s965_s27   ;;  %s687_s29 = sadd.s32 4294967294, %s965_s27   ;;  %s965_s27 = sphi %s1021_s27, %s1234_s27   ;;  %s961_s26 = sphi %s1019_s26, %s1233_s26   ;;  %s957_s25 = sphi %s1017_s25, %s1232_s25   ;;  %s953_s24 = sphi %s1015_s24, %s1231_s24  }
   0x5   : > { %s1040_s30 = sadd.s32 1, %s965_s27   ;;  %s180_s8 = sadd.s32 1, %s961_s26 }
   0x6   : > { %s177_s9 = ssub.s32 %s965_s27, %s1040_s30  ;;  %p190_p0 = scmp.ne.s32.totalorder %s961_s26, %s957_s25 }
   0x7   : > { %p178_p1 = scmp.eq.s32.totalorder %s177_s9, 0  ;;  %p191_p2 = scmp.eq.s32.totalorder %s1036_s28, 3 }
   0x8   : > { %p196_p3 = scmp.ne.s32.totalorder %s957_s25, %s953_s24  ;;  %p197_p4 = scmp.eq.s32.totalorder %s687_s29, 3 }
   0x9   : > { %s1051_s10 = scalar_select %p178_p1, %s961_s26, %s180_s8  }
   0xa   : > { %p1053_p5 = por %p191_p2, %p190_p0  ;;  %p1057_p6 = por %p197_p4, %p196_p3 }
   0xb   : > { %p688_p7 = scmp.ge.s32.totalorder %s965_s27, 1  ;;  %p204_p8 = scmp.lt.s32.totalorder %s965_s27, 5 }
   0xc   : > { %s1222_s11 = scalar_select %p1053_p5, 1, 0 }
   0xd   : > { %s1223_s12 = scalar_select %p1057_p6, 1, 0 }
   0xe   : > { %p1219_p9 = scmp.eq.s32.totalorder %s1036_s28, 0  ;;  %p1064_p10 = pnand %p688_p7, %p204_p8 }
   0xf   : > { %s967_s14 = smov [#allocation2]   ;;  %s871_s19 = scalar_lea.hbm %s1216_s5, 1024 }
  0x10   : > { %s1224_s13 = scalar_select %p1064_p10, 1, 0 }
  0x11   : > { %s228_s15 = sshll.u32 %s967_s14, 4  ;;  %p804_p11 = pneg %p1064_p10  ;;  %s229_s15 = int_to_ptr.vmem [resolvable:$true] %s228_s15 }
  0x12   : > { %p872_p13 = scmp.ne.s32.totalorder %s1216_s5, %s871_s19  ;;  %p878_p3 = scmp.lt.u32.totalorder %s871_s19, %s1216_s5 }
  0x13   : > { %p1072_p12 = pnand %p1219_p9, %p804_p11 }
  0x15   : > { %p873_p0 = pneg %p1072_p12 }
  0x17   : > { %p874_p1 = pnand %p873_p0, %p872_p13 }
  0x19   : > { %p875_p2 = pneg %p874_p1 }
  0x1b   : > { %p880_p4 = pnand %p878_p3, %p875_p2 }
  0x1d   : > { %883 = shalt.err (!%p880_p4)
}
  0x1e   : > { %s884_s29 = scalar_lea.vmem %s229_s15, 1024  ;;  %p892_p9 = scmp.lt.s32.totalorder %s229_s15, %s229_s15 }
  0x1f   : > { %p885_p7 = scmp.ne.s32.totalorder %s229_s15, %s884_s29  ;;  %p893_p6 = scmp.lt.s32.totalorder %s884_s29, %s884_s29 }
  0x21   : > { %p887_p8 = pnand %p885_p7, %p873_p0  ;;  %p894_p5 = por %p893_p6, %p892_p9 }
  0x23   : > { %p888_p11 = pneg %p887_p8 }
  0x25   : > { %p895_p10 = pnand %p894_p5, %p888_p11 }
  0x27   : > { %898 = shalt.err (!%p895_p10)
}
  0x28   : > { %s968_s8 = smov 64   ;;  %s969_s9 = smov 4  }
  0x29   : > { %807 = dma.hbm_to_vmem [thread:$0]  (!%p1072_p12), %s1216_s5, 1024, %s229_s15, [#allocation3], %s968_s8, %s968_s8, %s969_s9  }
  0x2a   : > { %p1226_p13 = scmp.ne.s32.totalorder %s1224_s13, 0 }
  0x2b   : > { %p1227_p1 = scmp.eq.s32.totalorder (!%p1226_p13), %s1036_s28, 0 }
  0x2c   : > { %256 = sbr.rel (%p1226_p13) target bundleno = 734 (0x2de), region = 48 }
  0x33   : > { %944 = dma.done.wait (%p1227_p1), [#allocation3], 1024   ;;  %p1228_p0 = pmov %p1227_p1 }
  0x34   : > { %s694_s18 = sshll.u32 %s1036_s28, 1  ;;  %v970_v0 = vmov 0.0   ;;  %vm971_vm0 = vmmov 0   ;;  %v854_v1 = vld [vmem:[%s1212_s1] sm:$0xff]   ;;  %vm314_vm1 = vcmask 130048   ;;  %v856_v6 = vld [vmem:[%s1214_s3 + $0x8] sm:$0xff]  }
  0x35   : > { %946 = vsyncadd (%p1228_p0), [#allocation3], 4294966272  ;;  %752 = vmatprep.subr.bf16.mxu0 %v970_v0  ;;  %754 = vmatprep.mubr.msk.bf16.mxu0 %vm971_vm0, %v970_v0  ;;  %p289_p5 = scmp.lt.s32.totalorder %s694_s18, 7  ;;  %v855_v5 = vld [vmem:[%s1214_s3] sm:$0xff]   ;;  %v857_v7 = vld [vmem:[%s1214_s3 + $0x10] sm:$0xff]   ;;  %s285_s17 = sand.u32 1, %s957_s25  }
  0x36   : > { %758 = vmatprep.subr.bf16.mxu1 %v970_v0  ;;  %774 = vmatprep.mubr.msk.bf16.mxu1 %vm971_vm0, %v970_v0  ;;  %v858_v8 = vld [vmem:[%s1214_s3 + $0x18] sm:$0xff]   ;;  %v859_v9 = vld [vmem:[%s1214_s3 + $0x20] sm:$0xff]   ;;  %v860_v10 = vld [vmem:[%s1214_s3 + $0x28] sm:$0xff]   ;;  %s726_s20 = sshll.u32 %s1036_s28, 7  ;;  %s1170_s29 = scalar_lea.sflag [#allocation4], %s285_s17 }
  0x37   : > { %s1236_s18 = smov (!%p289_p5, %s694_s18), 7  ;;  %753 = vmatpush3.bf16.msra.mxu0 %v854_v1  ;;  %759 = vmatpush3.bf16.msra.mxu1 %v855_v5  ;;  %v861_v11 = vld [vmem:[%s1214_s3 + $0x30] sm:$0xff]   ;;  %v862_v12 = vld [vmem:[%s1214_s3 + $0x38] sm:$0xff]   ;;  %v863_v13 = vld [vmem:[#allocation2] sm:$0xff]   ;;  %s1168_s23 = scalar_lea.hbm %s1218_s7, %s726_s20 }
  0x38   : > { %s695_s13 = sshll.u32 %s1236_s18, 3  ;;  %778 = vmatprep.subr.bf16.mxu0 %v970_v0  ;;  %760 = vmatprep.subr.bf16.mxu1 %v970_v0  ;;  %v864_v14 = vld [vmem:[#allocation2 + $0x8] sm:$0xff]   ;;  %v865_v15 = vld [vmem:[#allocation2 + $0x10] sm:$0xff]   ;;  %v866_v16 = vld [vmem:[#allocation2 + $0x18] sm:$0xff]   ;;  %s693_s18 = sshll.u32 %s285_s17, 3 }
  0x39   : > { %s292_s19 = scalar_lea.vmem %s1211_s0, %s695_s13  ;;  %v867_v17 = vld [vmem:[#allocation2 + $0x20] sm:$0xff]   ;;  %v868_v18 = vld [vmem:[#allocation2 + $0x28] sm:$0xff]   ;;  %v869_v29 = vld [vmem:[#allocation2 + $0x30] sm:$0xff]   ;;  %s287_s16 = scalar_lea.vmem [#allocation5], %s693_s18 }
  0x3a   : > { %v296_v2 = vld [vmem:[%s292_s19] sm:$0xff]  ;;  %v297_v3 = vld [vmem:[%s292_s19 + $0x8] sm:$0xff]  ;;  %v870_v30 = vld [vmem:[#allocation2 + $0x38] sm:$0xff]   ;;  %s613_s19 = sshll.u32 %s287_s16, 4  ;;  %p1229_p9 = scmp.ne.s32.totalorder %s1222_s11, 0  ;;  %s1163_s19 = int_to_ptr.vmem [resolvable:$true] %s613_s19 }
  0x3b   : > { %v298_v4 = vpack.c.bf16 %v297_v3, %v296_v2  ;;  %761 = vmatpush3.bf16.msra.mxu1 %v856_v6  ;;  %v696_v19 = vld [vmem:[%s1213_s2] ss:$0 sm:$0xff]  ;;  %s899_s8 = scalar_lea.vmem %s1163_s19, 128  ;;  %s972_s28 = smov [#allocation5]  }
  0x3c   : > { %762 = vmatprep.subr.bf16.mxu1 %v970_v0  ;;  %v699_v31 = vld [vmem:[%s1215_s4] ss:$0 sm:$0xff]  ;;  %p900_p6 = scmp.ne.s32.totalorder %s1163_s19, %s899_s8  ;;  %s903_s9 = sshll.u32 %s972_s28, 4  ;;  %s904_s9 = int_to_ptr.vmem [resolvable:$false] %s903_s9 }
  0x3d   : > { %755 = vmatmul.mubr.msk.bf16.vlgmr.msra.gmra.mrb[0].mxu0 %vm314_vm1, %v298_v4  ;;  %v708_v41 = vld [vmem:[%s1217_s6] ss:$0 sm:$0xff]  ;;  %s905_s14 = scalar_lea.vmem %s904_s9, 256  ;;  %p906_p2 = scmp.lt.s32.totalorder %s1163_s19, %s904_s9 }
  0x3e   : > { %794 = vmatprep.mubr.msk.bf16.mxu0 %vm971_vm0, %v970_v0  ;;  %779 = vmatpush3.bf16.msra.mxu0 %v863_v13  ;;  %p901_p10 = pnand %p900_p6, %p1229_p9  ;;  %p907_p3 = scmp.lt.s32.totalorder %s905_s14, %s899_s8 }
  0x3f   : > { %763 = vmatpush3.bf16.msra.mxu1 %v857_v7  ;;  %780 = vmatprep.subr.bf16.mxu0 %v970_v0 }
  0x40   : > { %764 = vmatprep.subr.bf16.mxu1 %v970_v0  ;;  %p902_p12 = pneg %p901_p10  ;;  %p908_p4 = por %p907_p3, %p906_p2 }
  0x42   : > { %781 = vmatpush3.bf16.msra.mxu0 %v864_v14  ;;  %p909_p7 = pnand %p908_p4, %p902_p12 }
  0x43   : > { %765 = vmatpush3.bf16.msra.mxu1 %v858_v8  ;;  %782 = vmatprep.subr.bf16.mxu0 %v970_v0 }
  0x44   : > { %766 = vmatprep.subr.bf16.mxu1 %v970_v0 }
  0x46   : > { %783 = vmatpush3.bf16.msra.mxu0 %v865_v15 }
  0x47   : > { %767 = vmatpush3.bf16.msra.mxu1 %v859_v9  ;;  %784 = vmatprep.subr.bf16.mxu0 %v970_v0 }
  0x48   : > { %768 = vmatprep.subr.bf16.mxu1 %v970_v0 }
  0x4a   : > { %785 = vmatpush3.bf16.msra.mxu0 %v866_v16 }
  0x4b   : > { %769 = vmatpush3.bf16.msra.mxu1 %v860_v10  ;;  %786 = vmatprep.subr.bf16.mxu0 %v970_v0 }
  0x4c   : > { %770 = vmatprep.subr.bf16.mxu1 %v970_v0 }
  0x4e   : > { %787 = vmatpush3.bf16.msra.mxu0 %v867_v17 }
  0x4f   : > { %771 = vmatpush3.bf16.msra.mxu1 %v861_v11  ;;  %788 = vmatprep.subr.bf16.mxu0 %v970_v0 }
  0x50   : > { %772 = vmatprep.subr.bf16.mxu1 %v970_v0 }
  0x52   : > { %789 = vmatpush3.bf16.msra.mxu0 %v868_v18 }
  0x53   : > { %773 = vmatpush3.bf16.msra.mxu1 %v862_v12  ;;  %790 = vmatprep.subr.bf16.mxu0 %v970_v0 }
  0x56   : > { %791 = vmatpush3.bf16.msra.mxu0 %v869_v29 }
  0x57   : > { %792 = vmatprep.subr.bf16.mxu0 %v970_v0 }
  0x5a   : > { %793 = vmatpush3.bf16.msra.mxu0 %v870_v30 }
 0x110   : > { %v352_v20 = vpop.f32.mrb[0].mxu0 }
 0x111   : > { %v353_v21 = vadd.f32 %v696_v19, %v352_v20  ;;  %v756_v22 = vpop.f32.mrb[1].mxu0 }
 0x112   : > { %v355_v23 = vpop.f32.mrb[2].mxu0 }
 0x113   : > { %v356_v24 = vadd.f32 %v696_v19, %v355_v23  ;;  %v757_v25 = vpop.f32.mrb[3].mxu0  ;;  %v359_v26 = vmax.f32 %v353_v21, 0.0 }
 0x115   : > { %v360_v27 = vmax.f32 %v356_v24, 0.0 }
 0x117   : > { %v361_v28 = vpack.c.bf16 %v360_v27, %v359_v26 }
 0x119   : > { %775 = vmatmul.mubr.bf16.vlgmr.msra.gmra.mrb[0].mxu1 %v361_v28 }
 0x1ec   : > { %v467_v32 = vpop.f32.mrb[0].mxu1 }
 0x1ed   : > { %v468_v33 = vadd.f32 %v699_v31, %v467_v32  ;;  %v776_v34 = vpop.f32.mrb[1].mxu1 }
 0x1ee   : > { %v470_v35 = vpop.f32.mrb[2].mxu1 }
 0x1ef   : > { %v471_v36 = vadd.f32 %v699_v31, %v470_v35  ;;  %v777_v37 = vpop.f32.mrb[3].mxu1  ;;  %v474_v38 = vmax.f32 %v468_v33, 0.0 }
 0x1f1   : > { %v475_v39 = vmax.f32 %v471_v36, 0.0 }
 0x1f3   : > { %v476_v40 = vpack.c.bf16 %v475_v39, %v474_v38 }
 0x1f5   : > { %795 = vmatmul.mubr.bf16.vlgmr.msra.gmra.mrb[4].mxu0 %v476_v40 }
 0x2c8   : > { %v582_v42 = vpop.f32.mrb[4].mxu0 }
 0x2c9   : > { %v796_v43 = vpop.f32.mrb[5].mxu0  ;;  %v583_v45 = vadd.f32 %v708_v41, %v582_v42 }
 0x2ca   : > { %v585_v44 = vpop.f32.mrb[6].mxu0 }
 0x2cb   : > { %v586_v46 = vadd.f32 %v708_v41, %v585_v44  ;;  %v797_v47 = vpop.f32.mrb[7].mxu0 }
 0x2cd   : > { %v730_v48 = vpack.c.bf16 %v586_v46, %v583_v45 }
 0x2cf   : > { %731 = vst [vmem:[%s287_s16] sm:$0xff] %v730_v48  }
 0x2d0   : > { %912 = shalt.err (!%p909_p7)
}
 0x2d1   : > { %s913_s17 = scalar_lea.hbm %s1168_s23, 128  ;;  %s917_s15 = scalar_lea.hbm %s1218_s7, 512 }
 0x2d2   : > { %p914_p8 = scmp.ne.s32.totalorder %s1168_s23, %s913_s17  ;;  %p918_p1 = scmp.lt.u32.totalorder %s1168_s23, %s1218_s7 }
 0x2d3   : > { %p919_p0 = scmp.lt.u32.totalorder %s917_s15, %s913_s17  ;;  %p921_p6 = scmp.lt.u32.totalorder %s913_s17, %s1168_s23 }
 0x2d4   : > { %p915_p11 = pnand %p914_p8, %p1229_p9 }
 0x2d5   : > { %p920_p5 = por %p919_p0, %p918_p1 }
 0x2d6   : > { %p916_p13 = pneg %p915_p11 }
 0x2d7   : > { %p922_p10 = por %p921_p6, %p920_p5 }
 0x2d9   : > { %p923_p12 = pnand %p922_p10, %p916_p13 }
 0x2db   : > { %926 = shalt.err (!%p923_p12)
}
 0x2dc   : > { %s973_s21 = smov 64   ;;  %s974_s22 = smov 4  }
 0x2dd   : > { %802 = dma.vmem_to_hbm [thread:$0]  (%p1229_p9), %s1163_s19, 128, %s1168_s23, %s1170_s29, %s973_s21, %s973_s21, %s974_s22  }
 0x2de PF: > { %p814_p2 = scmp.ge.s32.totalorder %s965_s27, 2  ;;  %s628_s8 = sand.u32 1, %s953_s24  }
 0x2df   : > { %p1230_p3 = scmp.ne.s32.totalorder %s1223_s12, 0  ;;  %s629_s28 = scalar_lea.sflag [#allocation4], %s628_s8 }
 0x2e1   : > { %p809_p4 = pnand %p814_p2, %p1230_p3 }
 0x2e3   : > { %948 = dma.done.wait (!%p809_p4), %s629_s28, 128  }
 0x2e4   : > { %950 = vsyncadd (!%p809_p4), %s629_s28, 4294967168  ;;  %p18_p7 = scmp.ge.s32.totalorder %s1040_s30, 6   ;;  %s1231_s24 = smov %s957_s25 }
 0x2e5   : > { %s1232_s25 = smov %s961_s26  ;;  %s1233_s26 = smov %s1051_s10 }
 0x2e6   : > { %s1234_s27 = smov %s1040_s30  ;;  %20 = sbr.rel (!%p18_p7) target bundleno = 4 (0x4), region = 88 }
 0x2ed   :  { %634 = vsyncpa [#allocation3], 1 }
 0x2ee   :  { %636 = vsyncpa [#allocation3 + $0x1], 1 }
 0x2ef   :  { %637 = vsyncpa [#allocation4], 1 }
 0x2f0   :  { %639 = vsyncpa [#allocation4 + $0x1], 1 }

</bundles_post_ra>
